<compile_context>
chip_gen: v5e
topology: v5e:2x2
jax: 0.10.0
libtpu: 0.0.40
codegen_flags: <defaults>
</compile_context>

<pallas_src>
import math

import jax
import jax.numpy as jnp
from jax.experimental import pallas as pl
from jax.experimental.pallas import tpu as pltpu


def _round_up(x, m):
    return ((x + m - 1) // m) * m


def _num_tensorcores_per_chip():
    """2 for v7x / megacore chips, 1 for v5e/v6e.  Never raises."""
    try:
        kind = jax.devices()[0].device_kind.lower()
    except Exception:
        return 1
    return 2 if any(t in kind for t in ("v7", "v4", "v5p")) else 1


def _axial_rope_kernel(a_ref, b_ref, mask_ref, sinw_ref, cosw_ref, sin_ref, cos_ref):
    # a_ref, b_ref, mask_ref: (1, P) resident lane tables (P | W, P % dim == 0).
    # sinw_ref, cosw_ref:     (1, W) row-invariant w-axis sin/cos tables
    #                         (zero in the h-axis channel lanes).
    # sin_ref, cos_ref:       (bh, W) output blocks.
    bh, W = sin_ref.shape
    P = a_ref.shape[-1]
    reps = W // P  # static

    # theta[row, lane] = pos_h(row) * scale(lane) for h-axis lanes, with
    # pos_step and the -1 offset folded into (a, b):  theta = row * a + b.
    row = jax.lax.broadcasted_iota(jnp.int32, (bh, P), 0) + pl.program_id(0) * bh
    theta = row.astype(jnp.float32) * a_ref[...] + b_ref[...]

    # Narrow transcendentals (h-axis channels only), zeroed in w-axis lanes.
    sin_h = jnp.sin(theta) * mask_ref[...]
    cos_h = jnp.cos(theta) * mask_ref[...]

    # Lane-aligned tiling to full width (pure vreg copies when P % 128 == 0).
    if reps > 1:
        sin_h = jnp.concatenate([sin_h] * reps, axis=-1)
        cos_h = jnp.concatenate([cos_h] * reps, axis=-1)

    sin_ref[...] = (sin_h + sinw_ref[...]).astype(sin_ref.dtype)
    cos_ref[...] = (cos_h + cosw_ref[...]).astype(cos_ref.dtype)


def axial_rotary_embedding(h, w, dim, max_freq=10, out_dtype=jnp.float32):
    """Returns (sin, cos), each of shape (1, h*w, dim), matching the PyTorch module."""
    assert dim % 4 == 0, "dim must be divisible by 4"
    dim4, dim2 = dim // 4, dim // 2
    W = w * dim

    # ---- buffer from __init__ (deterministic) ----
    scales = jnp.logspace(
        0.0, math.log(max_freq / 2) / math.log(2), dim4, base=2.0, dtype=jnp.float32
    )                                                    # (dim//4,)
    scale_rep = jnp.repeat(scales, 2) * math.pi          # (dim//2,) repeat-interleave * pi

    # ---- narrow lane tables for the h-axis channels (lane c = l % dim) ----
    #   c <  dim/2 : h-axis channel, slope scale_rep[c]
    #   c >= dim/2 : w-axis channel, served by the precomputed tables below
    a_chan = jnp.concatenate([scale_rep, jnp.zeros((dim2,), jnp.float32)])      # (dim,)
    m_chan = jnp.concatenate([jnp.ones((dim2,), jnp.float32),
                              jnp.zeros((dim2,), jnp.float32)])                 # (dim,)

    # P: widest lane period that is a multiple of dim, divides W, 128-aligned.
    P = dim * 128 // math.gcd(dim, 128)      # lcm(dim, 128)
    if W % P != 0:
        P = W
    a_tile = jnp.tile(a_chan, (P // dim,))
    m_tile = jnp.tile(m_chan, (P // dim,))

    # Fold pos_step and the -1 offset:  theta = row * (step*a) + (-a)
    pos_step = 2.0 / (h - 1) if h > 1 else 0.0   # torch.linspace(-1, 1, 1) == [-1]
    a_p = (pos_step * a_tile)[None, :]           # (1, P)
    b_p = (-a_tile)[None, :]                     # (1, P)
    mask_p = m_tile[None, :]                     # (1, P)

    # ---- row-invariant w-axis sin/cos tables, full width (computed once) ----
    w_lin = jnp.linspace(-1.0, 1.0, w, dtype=jnp.float32)                        # (w,)
    theta_w = w_lin[:, None] * scale_rep[None, :]                                # (w, dim/2)
    zeros_h = jnp.zeros((w, dim2), jnp.float32)
    sinw = jnp.concatenate([zeros_h, jnp.sin(theta_w)], axis=-1).reshape(1, W)
    cosw = jnp.concatenate([zeros_h, jnp.cos(theta_w)], axis=-1).reshape(1, W)

    # ---- block-size selection (lane-dense, out_dtype- and TC-count-aware) ----
    itemsize = jnp.dtype(out_dtype).itemsize
    sub = (8 * 4) // itemsize                    # sublane tile: 8 (f32) / 16 (bf16)
    budget = 8 * 1024 * 1024                     # double-buffered sin+cos blocks
    bytes_per_row = 2 * 2 * W * itemsize
    bh_cap = max(sub, (budget // bytes_per_row) // sub * sub)
    n_tc = _num_tensorcores_per_chip()
    if n_tc > 1 and h > sub:
        bh = _round_up(-(-h // n_tc), sub)       # balanced split across TensorCores
    else:
        bh = _round_up(h, sub)                   # single block on 1-TC chips if it fits
    bh = min(bh, bh_cap)
    if bh >= h:
        bh = h                                   # full-dim block is always legal
    grid = (pl.cdiv(h, bh),)                     # Pallas clips the partial tail block

    sin_work, cos_work = pl.pallas_call(
        _axial_rope_kernel,
        out_shape=(
            jax.ShapeDtypeStruct((h, W), out_dtype),
            jax.ShapeDtypeStruct((h, W), out_dtype),
        ),
        grid=grid,
        in_specs=[
            pl.BlockSpec((1, P), lambda i: (0, 0)),   # a': resident
            pl.BlockSpec((1, P), lambda i: (0, 0)),   # b': resident
            pl.BlockSpec((1, P), lambda i: (0, 0)),   # h-channel mask: resident
            pl.BlockSpec((1, W), lambda i: (0, 0)),   # sin(w-axis) table: resident
            pl.BlockSpec((1, W), lambda i: (0, 0)),   # cos(w-axis) table: resident
        ],
        out_specs=(
            pl.BlockSpec((bh, W), lambda i: (i, 0)),
            pl.BlockSpec((bh, W), lambda i: (i, 0)),
        ),
        compiler_params=pltpu.CompilerParams(
            dimension_semantics=("parallel",),
            vmem_limit_bytes=32 * 1024 * 1024,
        ),
    )(a_p, b_p, mask_p, sinw, cosw)

    # contiguous (h, w*dim) -> (1, h*w, dim): free reshape, no extra HBM pass
    sin = sin_work.reshape(h * w, dim)[None]
    cos = cos_work.reshape(h * w, dim)[None]
    return sin, cos


def _reference(h, w, dim, max_freq=10):
    """Pure-JAX reference mirroring the PyTorch forward."""
    dim4 = dim // 4
    scales = jnp.logspace(
        0.0, math.log(max_freq / 2) / math.log(2), dim4, base=2.0, dtype=jnp.float32
    )[None, :]
    h_seq = jnp.linspace(-1.0, 1.0, h, dtype=jnp.float32)[:, None] * scales * math.pi
    w_seq = jnp.linspace(-1.0, 1.0, w, dtype=jnp.float32)[:, None] * scales * math.pi
    x_sinu = jnp.broadcast_to(h_seq[:, None, :], (h, w, dim4))
    y_sinu = jnp.broadcast_to(w_seq[None, :, :], (h, w, dim4))
    sin = jnp.concatenate([jnp.sin(x_sinu), jnp.sin(y_sinu)], axis=-1).reshape(h * w, dim // 2)
    cos = jnp.concatenate([jnp.cos(x_sinu), jnp.cos(y_sinu)], axis=-1).reshape(h * w, dim // 2)
    sin = jnp.repeat(sin, 2, axis=-1)[None]
    cos = jnp.repeat(cos, 2, axis=-1)[None]
    return sin, cos


if __name__ == "__main__":
    # The module's forward takes only scalar sizes (h, w); no tensor inputs needed.
    key = jax.random.PRNGKey(0)
    del key

    h, w, dim = 16, 16, 32
    sin, cos = axial_rotary_embedding(h, w, dim)
    sin, cos = jax.block_until_ready((sin, cos))
    ref_sin, ref_cos = _reference(h, w, dim)
    assert sin.shape == (1, h * w, dim) and cos.shape == (1, h * w, dim)
    assert jnp.allclose(sin, ref_sin, atol=1e-4, rtol=1e-4)
    assert jnp.allclose(cos, ref_cos, atol=1e-4, rtol=1e-4)

    # Also exercise non-power-of-two sizes (odd h, w*dim not equal to P*reps of the first case).
    h2, w2 = 9, 12
    sin2, cos2 = axial_rotary_embedding(h2, w2, dim)
    sin2, cos2 = jax.block_until_ready((sin2, cos2))
    ref_sin2, ref_cos2 = _reference(h2, w2, dim)
    assert jnp.allclose(sin2, ref_sin2, atol=1e-4, rtol=1e-4)
    assert jnp.allclose(cos2, ref_cos2, atol=1e-4, rtol=1e-4)

    print("KERNEL_OK")
</pallas_src>

<mosaic_0001>
module attributes {stable_mosaic.version = 11 : i64} {
  func.func @_axial_rope_kernel(%arg0: i32, %arg1: memref<1x128xf32, #tpu.memory_space<vmem>>, %arg2: memref<1x128xf32, #tpu.memory_space<vmem>>, %arg3: memref<1x128xf32, #tpu.memory_space<vmem>>, %arg4: memref<1x512xf32, #tpu.memory_space<vmem>>, %arg5: memref<1x512xf32, #tpu.memory_space<vmem>>, %arg6: memref<16x512xf32, #tpu.memory_space<vmem>>, %arg7: memref<16x512xf32, #tpu.memory_space<vmem>>) attributes {dimension_semantics = [#tpu.dimension_semantics<parallel>], iteration_bounds = array<i64: 1>, scalar_prefetch = 0 : i64, scratch_operands = 0 : i64, tpu.core_type = #tpu.core_type<tc>, window_params = [{pipeline_mode = #tpu.pipeline_mode<synchronous>, transform_indices = @transform_0, window_bounds = array<i64: 1, 128>}, {pipeline_mode = #tpu.pipeline_mode<synchronous>, transform_indices = @transform_1, window_bounds = array<i64: 1, 128>}, {pipeline_mode = #tpu.pipeline_mode<synchronous>, transform_indices = @transform_2, window_bounds = array<i64: 1, 128>}, {pipeline_mode = #tpu.pipeline_mode<synchronous>, transform_indices = @transform_3, window_bounds = array<i64: 1, 512>}, {pipeline_mode = #tpu.pipeline_mode<synchronous>, transform_indices = @transform_4, window_bounds = array<i64: 1, 512>}, {transform_indices = @transform_5, window_bounds = array<i64: 16, 512>}, {transform_indices = @transform_6, window_bounds = array<i64: 16, 512>}]} {
    %0 = tpu.iota {dimensions = array<i32: 0>} : vector<16x128xi32>
    %c16_i32 = arith.constant 16 : i32
    %1 = arith.muli %arg0, %c16_i32 : i32
    %2 = vector.broadcast %1 : i32 to vector<16x128xi32>
    %3 = arith.addi %0, %2 : vector<16x128xi32>
    %4 = arith.sitofp %3 : vector<16x128xi32> to vector<16x128xf32>
    %c0 = arith.constant 0 : index
    %c0_0 = arith.constant 0 : index
    %5 = vector.load %arg1[%c0, %c0_0] : memref<1x128xf32, #tpu.memory_space<vmem>>, vector<1x128xf32>
    %6 = vector.broadcast %5 : vector<1x128xf32> to vector<16x128xf32>
    %7 = arith.mulf %4, %6 : vector<16x128xf32>
    %c0_1 = arith.constant 0 : index
    %c0_2 = arith.constant 0 : index
    %8 = vector.load %arg2[%c0_1, %c0_2] : memref<1x128xf32, #tpu.memory_space<vmem>>, vector<1x128xf32>
    %9 = vector.broadcast %8 : vector<1x128xf32> to vector<16x128xf32>
    %10 = arith.addf %7, %9 : vector<16x128xf32>
    %11 = math.sin %10 : vector<16x128xf32>
    %c0_3 = arith.constant 0 : index
    %c0_4 = arith.constant 0 : index
    %12 = vector.load %arg3[%c0_3, %c0_4] : memref<1x128xf32, #tpu.memory_space<vmem>>, vector<1x128xf32>
    %13 = vector.broadcast %12 : vector<1x128xf32> to vector<16x128xf32>
    %14 = arith.mulf %11, %13 : vector<16x128xf32>
    %15 = math.cos %10 : vector<16x128xf32>
    %c0_5 = arith.constant 0 : index
    %c0_6 = arith.constant 0 : index
    %16 = vector.load %arg3[%c0_5, %c0_6] : memref<1x128xf32, #tpu.memory_space<vmem>>, vector<1x128xf32>
    %17 = vector.broadcast %16 : vector<1x128xf32> to vector<16x128xf32>
    %18 = arith.mulf %15, %17 : vector<16x128xf32>
    %19 = tpu.concatenate %14, %14, %14, %14 in 1 : vector<16x128xf32>, vector<16x128xf32>, vector<16x128xf32>, vector<16x128xf32> -> vector<16x512xf32>
    %20 = tpu.concatenate %18, %18, %18, %18 in 1 : vector<16x128xf32>, vector<16x128xf32>, vector<16x128xf32>, vector<16x128xf32> -> vector<16x512xf32>
    %c0_7 = arith.constant 0 : index
    %c0_8 = arith.constant 0 : index
    %21 = vector.load %arg4[%c0_7, %c0_8] : memref<1x512xf32, #tpu.memory_space<vmem>>, vector<1x512xf32>
    %22 = vector.broadcast %21 : vector<1x512xf32> to vector<16x512xf32>
    %23 = arith.addf %19, %22 : vector<16x512xf32>
    %c0_9 = arith.constant 0 : index
    %c0_10 = arith.constant 0 : index
    %24 = vector.load %arg6[%c0_9, %c0_10] : memref<16x512xf32, #tpu.memory_space<vmem>>, vector<16x512xf32>
    tpu.vector_store %arg6[%c0_9, %c0_10], %23 {strides = array<i32>} : memref<16x512xf32, #tpu.memory_space<vmem>>, vector<16x512xf32>,
    %c0_11 = arith.constant 0 : index
    %c0_12 = arith.constant 0 : index
    %25 = vector.load %arg5[%c0_11, %c0_12] : memref<1x512xf32, #tpu.memory_space<vmem>>, vector<1x512xf32>
    %26 = vector.broadcast %25 : vector<1x512xf32> to vector<16x512xf32>
    %27 = arith.addf %20, %26 : vector<16x512xf32>
    %c0_13 = arith.constant 0 : index
    %c0_14 = arith.constant 0 : index
    %28 = vector.load %arg7[%c0_13, %c0_14] : memref<16x512xf32, #tpu.memory_space<vmem>>, vector<16x512xf32>
    tpu.vector_store %arg7[%c0_13, %c0_14], %27 {strides = array<i32>} : memref<16x512xf32, #tpu.memory_space<vmem>>, vector<16x512xf32>,
    return
  }
  func.func @transform_0(%arg0: i32) -> (i32, i32) {
    %c0_i32 = arith.constant 0 : i32
    %c0_i32_0 = arith.constant 0 : i32
    %c0_i32_1 = arith.constant 0 : i32
    return %c0_i32, %c0_i32_0 : i32, i32
  }
  func.func @transform_1(%arg0: i32) -> (i32, i32) {
    %c0_i32 = arith.constant 0 : i32
    %c0_i32_0 = arith.constant 0 : i32
    %c0_i32_1 = arith.constant 0 : i32
    return %c0_i32, %c0_i32_0 : i32, i32
  }
  func.func @transform_2(%arg0: i32) -> (i32, i32) {
    %c0_i32 = arith.constant 0 : i32
    %c0_i32_0 = arith.constant 0 : i32
    %c0_i32_1 = arith.constant 0 : i32
    return %c0_i32, %c0_i32_0 : i32, i32
  }
  func.func @transform_3(%arg0: i32) -> (i32, i32) {
    %c0_i32 = arith.constant 0 : i32
    %c0_i32_0 = arith.constant 0 : i32
    %c0_i32_1 = arith.constant 0 : i32
    return %c0_i32, %c0_i32_0 : i32, i32
  }
  func.func @transform_4(%arg0: i32) -> (i32, i32) {
    %c0_i32 = arith.constant 0 : i32
    %c0_i32_0 = arith.constant 0 : i32
    %c0_i32_1 = arith.constant 0 : i32
    return %c0_i32, %c0_i32_0 : i32, i32
  }
  func.func @transform_5(%arg0: i32) -> (i32, i32) {
    %c0_i32 = arith.constant 0 : i32
    %c0_i32_0 = arith.constant 0 : i32
    return %arg0, %c0_i32 : i32, i32
  }
  func.func @transform_6(%arg0: i32) -> (i32, i32) {
    %c0_i32 = arith.constant 0 : i32
    %c0_i32_0 = arith.constant 0 : i32
    return %arg0, %c0_i32 : i32, i32
  }
}

</mosaic_0001>

<bundles_post_ra>
// kernel: tpu_custom_call.1
= control target key start
LH: loop header
LB: loop body
LE: loop exit
PB: predicated region body
PF: predicated region fallthrough
CT: control target
= control target key end

     0   :  { %12 = vsyncpa [#allocation3], 0  ;;  %s1292_s0 = inlined_call_operand.hbm [shape: f32[1,128], index: 0, kind: input, shape index: {}]   ;;  %s1293_s1 = inlined_call_operand.hbm [shape: f32[1,128], index: 1, kind: input, shape index: {}]   ;;  %s1294_s2 = inlined_call_operand.vmem [shape: f32[1,128], index: 2, kind: input, shape index: {}]   ;;  %s1295_s3 = inlined_call_operand.hbm [shape: f32[1,512], index: 3, kind: input, shape index: {}]   ;;  %s1296_s4 = inlined_call_operand.hbm [shape: f32[1,512], index: 4, kind: input, shape index: {}]   ;;  %s1297_s5 = inlined_call_operand.hbm [shape: f32[16,512], index: 5, kind: output, shape index: {0}]   ;;  %s1298_s6 = inlined_call_operand.hbm [shape: f32[16,512], index: 6, kind: output, shape index: {1}]  }
   0x1   :  { %13 = vsyncpa [#allocation6], 0 }
   0x2   :  { %14 = vsyncpa [#allocation9], 0 }
   0x3   :  { %15 = vsyncpa [#allocation4], 0  ;;  %s33_s23 = sshll.u32 %s1293_s1, 4  ;;  %s34_s23 = int_to_ptr.hbm [resolvable:$true] %s33_s23 }
   0x4   :  { %16 = vsyncpa [#allocation12], 0  ;;  %s1001_s24 = smov [#allocation5]   ;;  %s22_s28 = sshll.u32 %s1292_s0, 4  ;;  %s23_s28 = int_to_ptr.hbm [resolvable:$true] %s22_s28 }
   0x5   :  { %s35_s25 = sshll.u32 %s1001_s24, 4  ;;  %s1002_s29 = smov [#allocation2]   ;;  %s36_s25 = int_to_ptr.vmem [resolvable:$true] %s35_s25 }
   0x6   :  { %38 = dma.hbm_to_vmem [thread:$0]  %s34_s23, 16, %s36_s25, [#allocation6]  }
   0x7   :  { %s24_s30 = sshll.u32 %s1002_s29, 4  ;;  %s46_s9 = sshll.u32 %s1295_s3, 4  ;;  %s25_s30 = int_to_ptr.vmem [resolvable:$true] %s24_s30  ;;  %s47_s9 = int_to_ptr.hbm [resolvable:$true] %s46_s9 }
   0x8   :  { %27 = dma.hbm_to_vmem [thread:$0]  %s23_s28, 16, %s25_s30, [#allocation3]  }
   0x9   :  { %s57_s11 = sshll.u32 %s1296_s4, 4  ;;  %s1003_s12 = smov [#allocation7]   ;;  %s58_s11 = int_to_ptr.hbm [resolvable:$true] %s57_s11 }
   0xa   :  { %s48_s13 = sshll.u32 %s1003_s12, 4  ;;  %s1004_s0 = smov [#allocation8]   ;;  %s49_s13 = int_to_ptr.vmem [resolvable:$true] %s48_s13 }
   0xb   :  { %51 = dma.hbm_to_vmem [thread:$0]  %s47_s9, 64, %s49_s13, [#allocation6]  }
   0xc   :  { %s59_s14 = sshll.u32 %s1004_s0, 4  ;;  %s60_s14 = int_to_ptr.vmem [resolvable:$true] %s59_s14 }
   0xd   :  { %62 = dma.hbm_to_vmem [thread:$0]  %s58_s11, 64, %s60_s14, [#allocation9]  }
   0xe   :  { %991 = dma.done.wait [#allocation3], 16  }
   0xf   :  { %992 = vsyncadd [#allocation3], 4294967280 }
  0x10   :  { %993 = dma.done.wait [#allocation6], 80  }
  0x11   :  { %994 = vsyncadd [#allocation6], 4294967216 }
  0x12   :  { %995 = dma.done.wait [#allocation9], 64  }
  0x13   :  { %996 = vsyncadd [#allocation9], 4294967232  ;;  %v79_v0 = vlaneseq  ;;  %v844_v5 = vld [vmem:[#allocation2] ss:$0 sm:$0xff]  ;;  %v845_v6 = vld [vmem:[#allocation5] ss:$0 sm:$0xff] }
  0x14   :  { %v1005_v32 = vmov 683565275   ;;  %v1006_v34 = vmov 2475754826   ;;  %v1007_v36 = vmov 2131351028  }
  0x15   :  { %v80_v1 = vshrl.u32 %v79_v0, 7  ;;  %v1008_v38 = vmov 2102212464   ;;  %v1009_v40 = vmov 920167782   ;;  %s784_s18 = sshll.u32 %s1297_s5, 4  ;;  %s785_s18 = int_to_ptr.hbm [resolvable:$true] %s784_s18 }
  0x16   :  { %v1010_v49 = vmov 1326507024   ;;  %s1013_s5 = smov [#allocation11]   ;;  %s797_s22 = sshll.u32 %s1298_s6, 4  ;;  %s798_s22 = int_to_ptr.hbm [resolvable:$true] %s797_s22 }
  0x17   :  { %v81_v2 = vadd.s32 8, %v80_v1  ;;  %v86_v3 = vcvt.s32.f32 %v80_v1  ;;  %s795_s19 = sshll.u32 %s1013_s5, 4  ;;  %s1014_s23 = smov 512   ;;  %s796_s19 = int_to_ptr.vmem [resolvable:$true] %s795_s19 }
  0x18   :  { %s1015_s24 = smov 32  }
  0x19   :  { %v87_v4 = vcvt.s32.f32 %v81_v2  ;;  %v92_v7 = vmul.f32 %v844_v5, %v86_v3 }
  0x1b   :  { %v93_v8 = vmul.f32 %v844_v5, %v87_v4  ;;  %v1063_v9 = vadd.f32 %v845_v6, %v92_v7 }
  0x1d   :  { %v1065_v10 = vadd.f32 %v845_v6, %v93_v8  ;;  %v100_v11 = vand.u32 2147483647, %v1063_v9  ;;  %v103_v12 = vand.u32 2139095040, %v1063_v9 }
  0x1f   :  { %v255_v13 = vand.u32 2147483647, %v1065_v10  ;;  %v258_v14 = vand.u32 2139095040, %v1065_v10  ;;  %v104_v15 = vshrl.u32 %v103_v12, 23  ;;  %v107_v16 = vand.u32 8388607, %v100_v11 }
  0x21   :  { %v259_v17 = vshrl.u32 %v258_v14, 23  ;;  %v817_v18 = vadd.s32 4294967169, %v104_v15  ;;  %v108_v19 = vor.u32 8388608, %v107_v16  ;;  %v262_v21 = vand.u32 8388607, %v255_v13 }
  0x23   :  { %v820_v20 = vadd.s32 4294967169, %v259_v17  ;;  %v110_v22 = vadd.s32 1, %v817_v18  ;;  %v1075_v25 = vshll.u32 %v108_v19, 8  ;;  %v263_v26 = vor.u32 8388608, %v262_v21 }
  0x25   :  { %v265_v23 = vadd.s32 1, %v820_v20  ;;  %vm111_vm0 = vcmp.gt.s32.totalorder %v110_v22, 0  ;;  %v149_v42 = vand.u32 65535, %v1075_v25  ;;  %v1085_v43 = vshll.u32 %v263_v26, 8 }
  0x26   :  { %v112_v24 = vsel %vm111_vm0, %v110_v22, 0  ;;  %v150_v47 = vshrl.u32 %v1075_v25, 16 }
  0x27   :  { %vm266_vm1 = vcmp.gt.s32.totalorder %v265_v23, 0  ;;  %v114_v27 = vand.u32 31, %v112_v24  ;;  %v1077_v29 = vshrl.u32 %v112_v24, 5 }
  0x28   :  { %v267_v28 = vsel %vm266_vm1, %v265_v23, 0 }
  0x29   :  { %v1079_v30 = vand.u32 31, %v267_v28  ;;  %v115_v31 = vsub.s32 32, %v114_v27  ;;  %v117_v33 = vshll.u32 %v1005_v32, %v114_v27  ;;  %v120_v35 = vshll.u32 %v1006_v34, %v114_v27 }
  0x2a   :  { %v123_v37 = vshll.u32 %v1007_v36, %v114_v27  ;;  %v126_v39 = vshll.u32 %v1008_v38, %v114_v27  ;;  %v129_v41 = vshll.u32 %v1009_v40, %v114_v27  ;;  %vm132_vm2 = vcmp.lt.s32.totalorder %v1077_v29, 1 }
  0x2b   :  { %v118_v44 = vshrl.u32 %v1006_v34, %v115_v31  ;;  %v121_v45 = vshrl.u32 %v1007_v36, %v115_v31  ;;  %v124_v46 = vshrl.u32 %v1008_v38, %v115_v31  ;;  %v127_v48 = vshrl.u32 %v1009_v40, %v115_v31 }
  0x2c   :  { %v130_v50 = vshrl.u32 %v1010_v49, %v115_v31  ;;  %vm135_vm3 = vcmp.lt.s32.totalorder %v1077_v29, 4  ;;  %v1094_v54 = vsub.s32 32, %v1079_v30  ;;  %v116_v55 = vshrl.u32 %v1005_v32, %v115_v31 }
  0x2d   :  { %v119_v51 = vor.u32 %v118_v44, %v117_v33  ;;  %v122_v52 = vor.u32 %v121_v45, %v120_v35  ;;  %v125_v53 = vor.u32 %v124_v46, %v123_v37  ;;  %v128_v56 = vor.u32 %v127_v48, %v126_v39 }
  0x2e   :  { %v131_v57 = vor.u32 %v130_v50, %v129_v41  ;;  %vm134_vm4 = vcmp.lt.s32.totalorder %v1077_v29, 3  ;;  %vm133_vm5 = vcmp.lt.s32.totalorder %v1077_v29, 2  ;;  %v1103_v60 = vshrl.u32 %v267_v28, 5 }
  0x2f   :  { %v140_v58 = vsel %vm132_vm2, %v119_v51, %v122_v52  ;;  %v144_v59 = vsel %vm132_vm2, %v122_v52, %v125_v53  ;;  %v141_v61 = vsel %vm135_vm3, %v128_v56, 920167782  ;;  %v272_v63 = vshll.u32 %v1005_v32, %v1079_v30 }
  0x30   :  { %v145_v62 = vsel %vm135_vm3, %v131_v57, 1326507024  ;;  %v275_v0 = vshll.u32 %v1006_v34, %v1079_v30  ;;  %v137_v1 = vsel %vm135_vm3, %v125_v53, 2102212464  ;;  %v142_v2 = vsel %vm134_vm4, %v125_v53, %v141_v61 }
  0x31   :  { %v146_v3 = vsel %vm134_vm4, %v128_v56, %v145_v62  ;;  %v273_v4 = vshrl.u32 %v1006_v34, %v1094_v54  ;;  %v136_v5 = vsel %vm132_vm2, %v116_v55, %v119_v51  ;;  %v143_v6 = vsel %vm133_vm5, %v140_v58, %v142_v2 }
  0x32   :  { %v147_v7 = vsel %vm133_vm5, %v144_v59, %v146_v3  ;;  %v276_v8 = vshrl.u32 %v1007_v36, %v1094_v54  ;;  %v173_v15 = vand.u32 65535, %v143_v6  ;;  %v174_v16 = vshrl.u32 %v143_v6, 16 }
  0x33   :  { %v151_v12 = vand.u32 65535, %v147_v7  ;;  %v152_v14 = vshrl.u32 %v147_v7, 16  ;;  %v138_v17 = vsel %vm134_vm4, %v122_v52, %v137_v1  ;;  %v1128_v18 = vor.u32 %v273_v4, %v272_v63 }
  0x34   :  { %v1130_v19 = vor.u32 %v276_v8, %v275_v0  ;;  %v278_v20 = vshll.u32 %v1007_v36, %v1079_v30  ;;  %v279_v24 = vshrl.u32 %v1008_v38, %v1094_v54  ;;  %v175_v27 = vmul.u32 %v173_v15, %v149_v42 }
  0x35   :  { %v153_v21 = vmul.u32 %v151_v12, %v149_v42  ;;  %v154_v22 = vmul.u32 %v152_v14, %v149_v42  ;;  %v155_v23 = vmul.u32 %v151_v12, %v150_v47  ;;  %v156_v26 = vmul.u32 %v152_v14, %v150_v47 }
  0x36   :  { %v176_v28 = vmul.u32 %v174_v16, %v149_v42  ;;  %v177_v31 = vmul.u32 %v173_v15, %v150_v47  ;;  %v178_v37 = vmul.u32 %v174_v16, %v150_v47  ;;  %v281_v48 = vshll.u32 %v1008_v38, %v1079_v30 }
  0x37   :  { %v157_v33 = vshll.u32 %v154_v22, 16  ;;  %v158_v34 = vshrl.u32 %v154_v22, 16  ;;  %v159_v35 = vshll.u32 %v155_v23, 16  ;;  %v160_v39 = vshrl.u32 %v155_v23, 16 }
  0x38   :  { %v179_v41 = vshll.u32 %v176_v28, 16  ;;  %v180_v44 = vshrl.u32 %v176_v28, 16  ;;  %v181_v45 = vshll.u32 %v177_v31, 16  ;;  %v182_v46 = vshrl.u32 %v177_v31, 16 }
  0x39   :  { %vm161_vm6 = vc.u32 %v153_v21, %v157_v33  ;;  %v163_v36 = vadd.s32 %v157_v33, %v153_v21  ;;  %v1011_v50 = vmov 0   ;;  %v282_v52 = vshrl.u32 %v1009_v40, %v1094_v54 }
  0x3a   :  { %v162_v51 = vsel %vm161_vm6, 1, %v1011_v50  ;;  %vm183_vm7 = vc.u32 %v175_v27, %v179_v41  ;;  %v185_v42 = vadd.s32 %v179_v41, %v175_v27  ;;  %v284_v55 = vshll.u32 %v1009_v40, %v1079_v30 }
  0x3b   :  { %v164_v53 = vadd.s32 %v162_v51, %v156_v26  ;;  %vm165_vm8 = vc.u32 %v163_v36, %v159_v35  ;;  %v184_v47 = vsel %vm183_vm7, 1, %v1011_v50  ;;  %v280_v38 = vor.u32 %v279_v24, %v278_v20 }
  0x3c   :  { %v166_v56 = vsel %vm165_vm8, 1, %v1011_v50  ;;  %v186_v57 = vadd.s32 %v184_v47, %v178_v37  ;;  %vm187_vm9 = vc.u32 %v185_v42, %v181_v45  ;;  %v283_v61 = vor.u32 %v282_v52, %v281_v48 }
  0x3d   :  { %v168_v58 = vadd.s32 %v166_v56, %v164_v53  ;;  %v188_v59 = vsel %vm187_vm9, 1, %v1011_v50  ;;  %v285_v62 = vshrl.u32 %v1010_v49, %v1094_v54  ;;  %v1147_v63 = vadd.s32 %v185_v42, %v181_v45 }
  0x3e   :  { %v190_v0 = vadd.s32 %v188_v59, %v186_v57  ;;  %vm287_vm10 = vcmp.lt.s32.totalorder %v1103_v60, 1  ;;  %vm289_vm11 = vcmp.lt.s32.totalorder %v1103_v60, 3  ;;  %vm288_vm12 = vcmp.lt.s32.totalorder %v1103_v60, 2 }
  0x3f   :  { %v169_v30 = vadd.s32 %v168_v58, %v158_v34  ;;  %v286_v40 = vor.u32 %v285_v62, %v284_v55  ;;  %vm290_vm13 = vcmp.lt.s32.totalorder %v1103_v60, 4  ;;  %v139_v1 = vsel %vm133_vm5, %v136_v5, %v138_v17 }
  0x40   :  { %v191_v2 = vadd.s32 %v190_v0, %v180_v44  ;;  %v295_v49 = vsel %vm287_vm10, %v1128_v18, %v1130_v19  ;;  %v296_v3 = vsel %vm290_vm13, %v283_v61, 920167782  ;;  %v299_v7 = vsel %vm287_vm10, %v1130_v19, %v280_v38 }
  0x41   :  { %v1161_v4 = vadd.s32 %v169_v30, %v160_v39  ;;  %v297_v6 = vsel %vm289_vm11, %v280_v38, %v296_v3  ;;  %v304_v29 = vand.u32 65535, %v1085_v43  ;;  %v300_v12 = vsel %vm290_vm13, %v286_v40, 1326507024 }
  0x42   :  { %v192_v5 = vadd.s32 %v191_v2, %v182_v46  ;;  %v298_v8 = vsel %vm288_vm12, %v295_v49, %v297_v6  ;;  %v305_v14 = vshrl.u32 %v1085_v43, 16  ;;  %v193_v15 = vmul.u32 %v1075_v25, %v139_v1 }
  0x43   :  { %vm195_vm14 = vc.u32 %v1161_v4, %v1147_v63  ;;  %v301_v16 = vsel %vm289_vm11, %v283_v61, %v300_v12  ;;  %v328_v17 = vand.u32 65535, %v298_v8  ;;  %v329_v22 = vshrl.u32 %v298_v8, 16 }
  0x44   :  { %v196_v20 = vadd.s32 1, %v192_v5  ;;  %v302_v21 = vsel %vm288_vm12, %v299_v7, %v301_v16  ;;  %v271_v23 = vshrl.u32 %v1005_v32, %v1094_v54  ;;  %v292_v39 = vsel %vm290_vm13, %v280_v38, 2102212464 }
  0x45   :  { %v306_v24 = vand.u32 65535, %v302_v21  ;;  %v307_v26 = vshrl.u32 %v302_v21, 16  ;;  %v330_v28 = vmul.u32 %v328_v17, %v304_v29  ;;  %v331_v25 = vmul.u32 %v329_v22, %v304_v29 }
  0x46   :  { %v197_v27 = vsel %vm195_vm14, %v196_v20, %v192_v5  ;;  %v332_v31 = vmul.u32 %v328_v17, %v305_v14  ;;  %v333_v48 = vmul.u32 %v329_v22, %v305_v14  ;;  %v291_v51 = vsel %vm287_vm10, %v271_v23, %v1128_v18 }
  0x47   :  { %v198_v33 = vadd.s32 %v197_v27, %v193_v15  ;;  %v308_v34 = vmul.u32 %v306_v24, %v304_v29  ;;  %v309_v35 = vmul.u32 %v307_v26, %v304_v29  ;;  %v310_v37 = vmul.u32 %v306_v24, %v305_v14 }
  0x48   :  { %v334_v41 = vshll.u32 %v331_v25, 16  ;;  %v311_v45 = vmul.u32 %v307_v26, %v305_v14  ;;  %v336_v32 = vshll.u32 %v332_v31, 16  ;;  %v293_v52 = vsel %vm289_vm11, %v1130_v19, %v292_v39 }
  0x49   :  { %v199_v44 = vadd.s32 536870912, %v198_v33  ;;  %v312_v36 = vshll.u32 %v309_v35, 16  ;;  %v314_v46 = vshll.u32 %v310_v37, 16  ;;  %v313_v57 = vshrl.u32 %v309_v35, 16 }
  0x4a   :  { %vm338_vm15 = vc.u32 %v330_v28, %v334_v41  ;;  %v340_v55 = vadd.s32 %v334_v41, %v330_v28  ;;  %v335_v59 = vshrl.u32 %v331_v25, 16  ;;  %v315_v62 = vshrl.u32 %v310_v37, 16 }
  0x4b   :  { %v1185_v54 = vshrl.u32 %v199_v44, 30  ;;  %vm316_vm0 = vc.u32 %v308_v34, %v312_v36  ;;  %v318_v42 = vadd.s32 %v312_v36, %v308_v34  ;;  %v339_v47 = vsel %vm338_vm15, 1, %v1011_v50 }
  0x4c   :  { %v317_v53 = vsel %vm316_vm0, 1, %v1011_v50  ;;  %v341_v18 = vadd.s32 %v339_v47, %v333_v48  ;;  %vm342_vm2 = vc.u32 %v340_v55, %v336_v32  ;;  %v337_v30 = vshrl.u32 %v332_v31, 16 }
  0x4d   :  { %v201_v56 = vshll.u32 %v1185_v54, 30  ;;  %v319_v38 = vadd.s32 %v317_v53, %v311_v45  ;;  %vm320_vm1 = vc.u32 %v318_v42, %v314_v46  ;;  %v343_v19 = vsel %vm342_vm2, 1, %v1011_v50 }
  0x4e   :  { %v321_v58 = vsel %vm320_vm1, 1, %v1011_v50  ;;  %v345_v40 = vadd.s32 %v343_v19, %v341_v18  ;;  %v344_v49 = vadd.s32 %v340_v55, %v336_v32  ;;  %v294_v3 = vsel %vm288_vm12, %v291_v51, %v293_v52 }
  0x4f   :  { %v202_v61 = vsub.s32 %v198_v33, %v201_v56  ;;  %v323_v0 = vadd.s32 %v321_v58, %v319_v38  ;;  %v348_v12 = vmul.u32 %v1085_v43, %v294_v3  ;;  %v194_v50 = vadd.s32 %v1147_v63, %v1161_v4 }
  0x50   :  { %v346_v6 = vadd.s32 %v345_v40, %v335_v59  ;;  %v224_v37 = vsub.s32 4, %v1185_v54  ;;  %vm102_vm7 = vcmp.lt.s32.totalorder %v1063_v9, 0  ;;  %vm101_vm8 = vcmp.le.f32.partialorder %v100_v11, 0.7853982 }
  0x51   :  { %vm203_vm3 = vcmp.lt.s32.totalorder %v202_v61, 0  ;;  %v204_v1 = vsub.s32 0, %v202_v61  ;;  %v324_v2 = vadd.s32 %v323_v0, %v313_v57  ;;  %vm257_vm11 = vcmp.lt.s32.totalorder %v1065_v10, 0 }
  0x52   :  { %v347_v8 = vadd.s32 %v346_v6, %v337_v30  ;;  %v225_v36 = vsel %vm102_vm7, %v224_v37, %v1185_v54  ;;  %vm1217_vm14 = vcmp.le.f32.partialorder %v255_v13, 0.7853982  ;;  %vm243_vm2 = vweird.f32 %v1063_v9 }
  0x53   :  { %v205_v7 = vsel %vm203_vm3, %v204_v1, %v202_v61  ;;  %v325_v29 = vadd.s32 %v324_v2, %v315_v62  ;;  %v227_v42 = vsel %vm101_vm8, 0, %v225_v36 }
  0x54   :  { %v206_v5 = vclz %v205_v7  ;;  %v351_v15 = vadd.s32 1, %v347_v8  ;;  %v244_v59 = vadd.s32 3, %v227_v42 }
  0x55   :  { %vm350_vm4 = vc.u32 %v325_v29, %v344_v49  ;;  %v349_v51 = vadd.s32 %v344_v49, %v325_v29  ;;  %v560_v49 = vand.u32 3, %v227_v42 }
  0x56   :  { %v818_v14 = vadd.s32 4294967294, %v206_v5  ;;  %v352_v16 = vsel %vm350_vm4, %v351_v15, %v347_v8  ;;  %v245_v40 = vand.u32 3, %v244_v59  ;;  %v1213_v15 = vld [vmem:[#allocation7] sm:$0xf] }
  0x57   :  { %v353_v20 = vadd.s32 %v352_v16, %v348_v12  ;;  %vm565_vm12 = vcmp.eq.s32.totalorder %v560_v49, 2  ;;  %vm562_vm0 = vcmp.eq.s32.totalorder %v560_v49, 0  ;;  %vm561_vm1 = vcmp.lt.s32.totalorder %v560_v49, 2 }
  0x58   :  { %vm819_vm5 = vcmp.lt.s32.totalorder %v818_v14, 0  ;;  %vm250_vm10 = vcmp.eq.s32.totalorder %v245_v40, 2  ;;  %vm246_vm13 = vcmp.lt.s32.totalorder %v245_v40, 2  ;;  %vm247_vm15 = vcmp.eq.s32.totalorder %v245_v40, 0 }
  0x59   :  { %v209_v17 = vsel %vm819_vm5, 0, %v818_v14  ;;  %v354_v23 = vadd.s32 536870912, %v353_v20  ;;  %v728_v13 = vperm.slane %v1213_v15, 0  ;;  %v731_v37 = vperm.slane %v1213_v15, 3 }
  0x5a   :  { %v210_v21 = vsub.s32 32, %v209_v17  ;;  %v211_v60 = vshll.u32 %v202_v61, %v209_v17  ;;  %v214_v22 = vsub.s32 4294967266, %v209_v17 }
  0x5b   :  { %v1203_v27 = vshrl.u32 %v354_v23, 30  ;;  %v729_v23 = vperm.slane %v1213_v15, 1 }
  0x5c   :  { %v212_v24 = vshrl.u32 %v194_v50, %v210_v21  ;;  %v215_v26 = vadd.s32 127, %v214_v22  ;;  %v1226_v22 = vld [vmem:[%s1294_s2] ss:$0 sm:$0xff]  ;;  %s1012_s2 = smov [#allocation10]  }
  0x5d   :  { %v356_v25 = vshll.u32 %v1203_v27, 30  ;;  %v379_v17 = vsub.s32 4, %v1203_v27  ;;  %s782_s15 = sshll.u32 %s1012_s2, 4  ;;  %s783_s15 = int_to_ptr.vmem [resolvable:$true] %s782_s15 }
  0x5e   :  { %v213_v28 = vor.u32 %v212_v24, %v211_v60  ;;  %v216_v43 = vshll.u32 %v215_v26, 23  ;;  %v1232_v26 = vld [vmem:[#allocation8] sm:$0xf] }
  0x5f   :  { %v357_v34 = vsub.s32 %v353_v20, %v356_v25  ;;  %v756_v42 = vperm.slane %v1232_v26, 2 }
  0x60   :  { %v217_v31 = vor.u32 4788187, %v216_v43  ;;  %v220_v33 = vcvt.s32.f32 %v213_v28  ;;  %v730_v43 = vperm.slane %v1213_v15, 2 }
  0x61   :  { %vm358_vm6 = vcmp.lt.s32.totalorder %v357_v34, 0  ;;  %v359_v4 = vsub.s32 0, %v357_v34 }
  0x62   :  { %v218_v63 = vand.u32 2147483647, %v217_v31 }
  0x63   :  { %v360_v39 = vsel %vm358_vm6, %v359_v4, %v357_v34 }
  0x64   :  { %v221_v35 = vmul.f32 %v220_v33, %v218_v63  ;;  %v361_v44 = vclz %v360_v39 }
  0x66   :  { %v222_v41 = vxor.u32 2147483648, %v221_v35  ;;  %v821_v46 = vadd.s32 4294967294, %v361_v44 }
  0x68   :  { %v223_v45 = vsel %vm102_vm7, %v222_v41, %v221_v35  ;;  %vm822_vm9 = vcmp.lt.s32.totalorder %v821_v46, 0  ;;  %v754_v41 = vperm.slane %v1232_v26, 0 }
  0x69   :  { %v226_v48 = vsel %vm101_vm8, %v1063_v9, %v223_v45  ;;  %v364_v52 = vsel %vm822_vm9, 0, %v821_v46  ;;  %vm398_vm9 = vweird.f32 %v1065_v10 }
  0x6a   :  { %v228_v32 = vmul.f32 %v226_v48, %v226_v48  ;;  %v365_v55 = vsub.s32 32, %v364_v52  ;;  %v366_v56 = vshll.u32 %v357_v34, %v364_v52  ;;  %v369_v57 = vsub.s32 4294967266, %v364_v52 }
  0x6b   :  { %v380_v34 = vsel %vm257_vm11, %v379_v17, %v1203_v27 }
  0x6c   :  { %v229_v53 = vmul.f32 -0.001358992, %v228_v32  ;;  %v236_v47 = vmul.f32 -0.00019511016, %v228_v32  ;;  %v367_v58 = vshrl.u32 %v349_v51, %v365_v55  ;;  %v370_v18 = vadd.s32 127, %v369_v57 }
  0x6d   :  { %v382_v27 = vsel %vm1217_vm14, 0, %v380_v34  ;;  %v757_v55 = vperm.slane %v1232_v26, 3 }
  0x6e   :  { %v230_v38 = vadd.f32 0.041655596, %v229_v53  ;;  %v237_v11 = vadd.f32 0.008332121, %v236_v47  ;;  %v368_v62 = vor.u32 %v367_v58, %v366_v56  ;;  %v371_v0 = vshll.u32 %v370_v18, 23 }
  0x6f   :  { %v399_v56 = vadd.s32 3, %v382_v27 }
  0x70   :  { %v231_v61 = vmul.f32 %v230_v38, %v228_v32  ;;  %v238_v54 = vmul.f32 %v237_v11, %v228_v32  ;;  %v372_v1 = vor.u32 4788187, %v371_v0  ;;  %v375_v2 = vcvt.s32.f32 %v368_v62 }
  0x71   :  { %v400_v62 = vand.u32 3, %v399_v56  ;;  %v714_v0 = vand.u32 3, %v382_v27 }
  0x72   :  { %v232_v19 = vadd.f32 -0.4999988, %v231_v61  ;;  %v239_v30 = vadd.f32 -0.16666654, %v238_v54  ;;  %v373_v7 = vand.u32 2147483647, %v372_v1 }
  0x73   :  { %vm405_vm3 = vcmp.eq.s32.totalorder %v400_v62, 2  ;;  %vm719_vm4 = vcmp.eq.s32.totalorder %v714_v0, 2  ;;  %vm401_vm5 = vcmp.lt.s32.totalorder %v400_v62, 2  ;;  %vm402_vm6 = vcmp.eq.s32.totalorder %v400_v62, 0 }
  0x74   :  { %v233_v3 = vmul.f32 %v232_v19, %v228_v32  ;;  %v240_v6 = vmul.f32 %v239_v30, %v228_v32  ;;  %v376_v8 = vmul.f32 %v375_v2, %v373_v7  ;;  %vm716_vm7 = vcmp.eq.s32.totalorder %v714_v0, 0 }
  0x75   :  { %vm715_vm8 = vcmp.lt.s32.totalorder %v714_v0, 2 }
  0x76   :  { %v234_v29 = vadd.f32 1.0, %v233_v3  ;;  %v241_v5 = vadd.f32 1.0, %v240_v6  ;;  %v377_v16 = vxor.u32 2147483648, %v376_v8 }
  0x78   :  { %v242_v12 = vmul.f32 %v241_v5, %v226_v48  ;;  %v251_v14 = vxor.u32 2147483648, %v234_v29  ;;  %v378_v24 = vsel %vm257_vm11, %v377_v16, %v376_v8  ;;  %v755_v48 = vperm.slane %v1232_v26, 1 }
  0x79   :  { %v381_v25 = vsel %vm1217_vm14, %v1065_v10, %v378_v24 }
  0x7a   :  { %v248_v20 = vxor.u32 2147483648, %v242_v12  ;;  %v252_v21 = vsel %vm250_vm10, %v251_v14, %v242_v12  ;;  %v567_v60 = vsel %vm565_vm12, %v251_v14, %v242_v12  ;;  %v383_v63 = vmul.f32 %v381_v25, %v381_v25 }
  0x7c   :  { %v249_v28 = vsel %vm247_vm15, %v234_v29, %v248_v20  ;;  %v564_v31 = vsel %vm562_vm0, %v234_v29, %v248_v20  ;;  %v384_v45 = vmul.f32 -0.001358992, %v383_v63  ;;  %v391_v36 = vmul.f32 -0.00019511016, %v383_v63 }
  0x7d   :  { %v253_v33 = vsel %vm246_vm13, %v249_v28, %v252_v21  ;;  %v568_v4 = vsel %vm561_vm1, %v564_v31, %v567_v60 }
  0x7e   :  { %v254_v35 = vsel %vm243_vm2, nan, %v253_v33  ;;  %v569_v39 = vsel %vm243_vm2, nan, %v568_v4  ;;  %v385_v53 = vadd.f32 0.041655596, %v384_v45  ;;  %v392_v47 = vadd.f32 0.008332121, %v391_v36 }
  0x7f   :  { %v414_v44 = vmul.f32 %v1226_v22, %v254_v35  ;;  %v724_v46 = vmul.f32 %v1226_v22, %v569_v39 }
  0x80   :  { %v386_v38 = vmul.f32 %v385_v53, %v383_v63  ;;  %v393_v11 = vmul.f32 %v392_v47, %v383_v63 }
  0x81   :  { %v736_v32 = vadd.f32 %v728_v13, %v414_v44  ;;  %v737_v9 = vadd.f32 %v729_v23, %v414_v44  ;;  %v738_v51 = vadd.f32 %v730_v43, %v414_v44  ;;  %v739_v52 = vadd.f32 %v731_v37, %v414_v44 }
  0x82   :  { %v762_v57 = vadd.f32 %v754_v41, %v724_v46  ;;  %v763_v58 = vadd.f32 %v755_v48, %v724_v46  ;;  %v764_v59 = vadd.f32 %v756_v42, %v724_v46  ;;  %v387_v18 = vadd.f32 -0.4999988, %v386_v38 }
  0x83   :  { %744 = vst [vmem:[#allocation10] sm:$0xff] %v736_v32  ;;  %v394_v61 = vadd.f32 -0.16666654, %v393_v11  ;;  %v765_v54 = vadd.f32 %v757_v55, %v724_v46 }
  0x84   :  { %745 = vst [vmem:[#allocation10 + $0x8] sm:$0xff] %v737_v9  ;;  %v388_v19 = vmul.f32 %v387_v18, %v383_v63 }
  0x85   :  { %746 = vst [vmem:[#allocation10 + $0x10] sm:$0xff] %v738_v51  ;;  %v395_v30 = vmul.f32 %v394_v61, %v383_v63 }
  0x86   :  { %747 = vst [vmem:[#allocation10 + $0x18] sm:$0xff] %v739_v52  ;;  %v389_v40 = vadd.f32 1.0, %v388_v19 }
  0x87   :  { %770 = vst [vmem:[#allocation11] sm:$0xff] %v762_v57  ;;  %v396_v1 = vadd.f32 1.0, %v395_v30 }
  0x88   :  { %771 = vst [vmem:[#allocation11 + $0x8] sm:$0xff] %v763_v58  ;;  %v406_v49 = vxor.u32 2147483648, %v389_v40 }
  0x89   :  { %772 = vst [vmem:[#allocation11 + $0x10] sm:$0xff] %v764_v59  ;;  %v397_v2 = vmul.f32 %v396_v1, %v381_v25 }
  0x8a   :  { %773 = vst [vmem:[#allocation11 + $0x18] sm:$0xff] %v765_v54 }
  0x8b   :  { %v403_v3 = vxor.u32 2147483648, %v397_v2  ;;  %v407_v6 = vsel %vm405_vm3, %v406_v49, %v397_v2  ;;  %v721_v7 = vsel %vm719_vm4, %v406_v49, %v397_v2 }
  0x8d   :  { %v404_v29 = vsel %vm402_vm6, %v389_v40, %v403_v3  ;;  %v718_v5 = vsel %vm716_vm7, %v389_v40, %v403_v3 }
  0x8e   :  { %v408_v8 = vsel %vm401_vm5, %v404_v29, %v407_v6  ;;  %v722_v12 = vsel %vm715_vm8, %v718_v5, %v721_v7 }
  0x8f   :  { %v409_v14 = vsel %vm398_vm9, nan, %v408_v8  ;;  %v723_v50 = vsel %vm398_vm9, nan, %v722_v12 }
  0x90   :  { %v415_v16 = vmul.f32 %v1226_v22, %v409_v14  ;;  %v725_v17 = vmul.f32 %v1226_v22, %v723_v50 }
  0x92   :  { %v740_v20 = vadd.f32 %v728_v13, %v415_v16  ;;  %v741_v10 = vadd.f32 %v729_v23, %v415_v16  ;;  %v742_v21 = vadd.f32 %v730_v43, %v415_v16  ;;  %v743_v60 = vadd.f32 %v731_v37, %v415_v16 }
  0x93   :  { %v766_v22 = vadd.f32 %v754_v41, %v725_v17  ;;  %v767_v24 = vadd.f32 %v755_v48, %v725_v17  ;;  %v768_v13 = vadd.f32 %v756_v42, %v725_v17  ;;  %v769_v15 = vadd.f32 %v757_v55, %v725_v17 }
  0x94   :  { %748 = vst [vmem:[#allocation10 + $0x20] sm:$0xff] %v740_v20 }
  0x95   :  { %749 = vst [vmem:[#allocation10 + $0x28] sm:$0xff] %v741_v10 }
  0x96   :  { %750 = vst [vmem:[#allocation10 + $0x30] sm:$0xff] %v742_v21 }
  0x97   :  { %751 = vst [vmem:[#allocation10 + $0x38] sm:$0xff] %v743_v60 }
  0x98   :  { %774 = vst [vmem:[#allocation11 + $0x20] sm:$0xff] %v766_v22  ;;  %790 = dma.vmem_to_hbm [thread:$0]  %s783_s15, 1024, %s785_s18, [#allocation4], %s1014_s23, %s1014_s23, %s1015_s24  }
  0x99   :  { %775 = vst [vmem:[#allocation11 + $0x28] sm:$0xff] %v767_v24 }
  0x9a   :  { %776 = vst [vmem:[#allocation11 + $0x30] sm:$0xff] %v768_v13 }
  0x9b   :  { %777 = vst [vmem:[#allocation11 + $0x38] sm:$0xff] %v769_v15 }
  0x9c   :  { %803 = dma.vmem_to_hbm [thread:$0]  %s796_s19, 1024, %s798_s22, [#allocation12], %s1014_s23, %s1014_s23, %s1015_s24  }
  0x9d   :  { %997 = dma.done.wait [#allocation4], 1024  }
  0x9e   :  { %998 = vsyncadd [#allocation4], 4294966272 }
  0x9f   :  { %999 = dma.done.wait [#allocation12], 1024  }
  0xa0   :  { %1000 = vsyncadd [#allocation12], 4294966272 }
  0xa1   :  { %812 = vsyncpa [#allocation3], 1 }
  0xa2   :  { %813 = vsyncpa [#allocation6], 1 }
  0xa3   :  { %814 = vsyncpa [#allocation9], 1 }
  0xa4   :  { %815 = vsyncpa [#allocation4], 1 }
  0xa5   :  { %816 = vsyncpa [#allocation12], 1 }

</bundles_post_ra>
